<compile_context>
chip_gen: v7x
topology: tpu7x:2x2x1
jax: 0.10.0
libtpu: 0.0.40
codegen_flags: <defaults>
</compile_context>

<pallas_src>
import jax
import jax.numpy as jnp
from jax.experimental import pallas as pl
from jax.experimental.pallas import tpu as pltpu


def _round_down(x: int, m: int) -> int:
    return (x // m) * m


def _sublane_for(dtype) -> int:
    # 8 sublanes for 4-byte dtypes, 16 for 2-byte, 32 for 1-byte.
    return max(8, 32 // jnp.dtype(dtype).itemsize)


def pallas_lambda(func, *, size_threshold_bytes=1 << 20, max_lanes=1024,
                  target_block_bytes=4 << 20, inplace=True):
    """Returns a callable equivalent to torch Lambda(func) for elementwise func.

    - Inputs smaller than `size_threshold_bytes` bypass Pallas (launch overhead
      dwarfs the work; XLA fuses the elementwise op for free).
    - Larger inputs are reshaped (no copy) into a lane-dense (rows, lanes) slab
      and streamed through a row-tiled, double-buffered Pallas grid.
    - `target_block_bytes` (~4 MiB default) sets the per-buffer tile size.
    - `inplace=True` aliases the output onto the input slab for
      dtype-preserving funcs (XLA inserts a copy only if the input stays live).
    """
    assert max_lanes % 128 == 0

    def _kernel(x_ref, o_ref):
        o_ref[...] = func(x_ref[...])

    def _pallas_forward(x, out_dtype):
        orig_shape = x.shape
        in_dtype = x.dtype
        total = x.size
        in_itemsize = jnp.dtype(in_dtype).itemsize
        out_itemsize = jnp.dtype(out_dtype).itemsize

        # Largest multiple of 128 (<= max_lanes) dividing the element count.
        lanes = 0
        cand = max_lanes
        while cand >= 128:
            if total % cand == 0:
                lanes = cand
                break
            cand //= 2
        if lanes == 0:
            # total % 128 != 0: forming a slab would need a jnp.pad + output
            # slice (1-2 extra full HBM passes), which costs more than letting
            # XLA run the fused elementwise op at ~roofline.
            # TODO(synk): could run the 128-aligned prefix through Pallas and a
            # <128-element tail in JAX, but the concat re-copies the output.
            return func(x)

        rows = total // lanes

        # Sublane granularity must satisfy both the input and output dtypes
        # (e.g. a f32 -> bf16 cast lambda needs 16-row alignment).
        sublane = max(_sublane_for(in_dtype), _sublane_for(out_dtype))

        # Rows per block: ~target_block_bytes per input buffer, sublane-aligned.
        tile_r = max(sublane,
                     _round_down(target_block_bytes // (lanes * in_itemsize),
                                 sublane))
        if rows <= tile_r:
            tile_r = rows  # one block == full array dims (always a legal block)
        grid_r = pl.cdiv(rows, tile_r)  # last block may be partial -> masked

        x2d = x.reshape(rows, lanes)  # pure reshape: no pad, no copy

        alias = {0: 0} if (inplace and out_dtype == in_dtype) else {}

        block_in = tile_r * lanes * in_itemsize
        block_out = tile_r * lanes * out_itemsize
        # 2 live buffers each for input & output (default double buffering)
        # plus headroom.  Never below the smallest scoped default (16 MiB,
        # v5e), never above 32 MiB (safe on v7x's 64 MiB physical VMEM).
        vmem_limit = min(32 << 20, max(16 << 20, 2 * (block_in + block_out) + (4 << 20)))

        out2d = pl.pallas_call(
            _kernel,
            out_shape=jax.ShapeDtypeStruct((rows, lanes), out_dtype),
            grid=(grid_r,),
            in_specs=[pl.BlockSpec((tile_r, lanes), lambda i: (i, 0))],
            out_specs=pl.BlockSpec((tile_r, lanes), lambda i: (i, 0)),
            input_output_aliases=alias,
            cost_estimate=pl.CostEstimate(
                flops=total,
                transcendentals=0,
                bytes_accessed=total * (in_itemsize + out_itemsize)),
            compiler_params=pltpu.CompilerParams(
                # Row tiles are independent -> shard across both v7x
                # TensorCores; measured neutral on single-TC v5e/v6e.
                dimension_semantics=("parallel",),
                vmem_limit_bytes=vmem_limit,
            ),
        )(x2d)

        return out2d.reshape(orig_shape)

    def forward(x):
        if x.size == 0:
            return func(x)
        nbytes = x.size * jnp.dtype(x.dtype).itemsize
        if nbytes < size_threshold_bytes:
            # KB-scale tensors: plain JAX, let XLA fuse into neighbors.
            return func(x)
        # Probe: derive output dtype and reject shape-changing (non-elementwise
        # in the slab sense) funcs, which fall back to plain JAX.
        probe = jax.ShapeDtypeStruct((8, 128), x.dtype)
        try:
            out_aval = jax.eval_shape(func, probe)
        except Exception:
            return func(x)
        if out_aval.shape != probe.shape:
            return func(x)
        return _pallas_forward(x, out_aval.dtype)

    return forward


if __name__ == "__main__":
    key = jax.random.PRNGKey(0)
    k1, k2, k3, k4 = jax.random.split(key, 4)

    relu = lambda v: jnp.maximum(v, 0.0)

    # 1) Small NCHW input consistent with conv-style Lambda(F.relu).  Force the
    #    Pallas path (threshold 0): rows=2 -> single full-array block, grid=1.
    x_small = jax.random.normal(k1, (2, 4, 16, 16), dtype=jnp.float32)
    fwd_small = pallas_lambda(relu, size_threshold_bytes=0)
    out_small = jax.block_until_ready(fwd_small(x_small))
    assert out_small.shape == x_small.shape and out_small.dtype == x_small.dtype
    assert jnp.array_equal(out_small, relu(x_small))

    # 2) Ragged multi-step grid: rows=60, tile_r=32 -> 2 steps with a masked
    #    partial last block (no pad, no output slice).  Jitted usage.
    x_rag = jax.random.normal(k2, (5, 3, 64, 64), dtype=jnp.float32)
    fwd_rag = jax.jit(pallas_lambda(relu, size_threshold_bytes=0,
                                    target_block_bytes=1 << 17))
    out_rag = jax.block_until_ready(fwd_rag(x_rag))
    assert out_rag.shape == x_rag.shape and out_rag.dtype == x_rag.dtype
    assert jnp.array_equal(out_rag, relu(x_rag))

    # 3) Dtype-changing lambda (f32 -> bf16 cast): output dtype derived via
    #    eval_shape, in-place aliasing skipped, 16-row sublane alignment.
    cast_fn = lambda v: v.astype(jnp.bfloat16)
    x_cast = jax.random.normal(k3, (4, 8, 32, 32), dtype=jnp.float32)
    fwd_cast = pallas_lambda(cast_fn, size_threshold_bytes=0,
                             target_block_bytes=1 << 17)
    out_cast = jax.block_until_ready(fwd_cast(x_cast))
    assert out_cast.shape == x_cast.shape and out_cast.dtype == jnp.bfloat16
    assert jnp.array_equal(out_cast, x_cast.astype(jnp.bfloat16))

    # 4) Larger input (4 MiB) on the default config: 4 MiB block, default
    #    1 MiB threshold takes the Pallas path.
    x_big = jax.random.normal(k4, (8, 32, 64, 64), dtype=jnp.float32)
    fwd_big = jax.jit(pallas_lambda(relu))
    out_big = jax.block_until_ready(fwd_big(x_big))
    assert out_big.shape == x_big.shape and out_big.dtype == x_big.dtype
    assert jnp.array_equal(out_big, relu(x_big))

    print("KERNEL_OK")
</pallas_src>

<mosaic_0001>
module attributes {stable_mosaic.version = 11 : i64} {
  func.func @_kernel(%arg0: i32, %arg1: memref<2x1024xf32, #tpu.memory_space<vmem>>, %arg2: memref<2x1024xf32, #tpu.memory_space<vmem>>) attributes {dimension_semantics = [#tpu.dimension_semantics<parallel>], iteration_bounds = array<i64: 1>, scalar_prefetch = 0 : i64, scratch_operands = 0 : i64, tpu.core_type = #tpu.core_type<tc>, window_params = [{transform_indices = @transform_0, window_bounds = array<i64: 2, 1024>}, {transform_indices = @transform_1, window_bounds = array<i64: 2, 1024>}]} {
    %c0 = arith.constant 0 : index
    %c0_0 = arith.constant 0 : index
    %0 = vector.load %arg1[%c0, %c0_0] : memref<2x1024xf32, #tpu.memory_space<vmem>>, vector<2x1024xf32>
    %cst = arith.constant 0.000000e+00 : f32
    %1 = vector.broadcast %cst : f32 to vector<2x1024xf32>
    %2 = arith.maximumf %0, %1 : vector<2x1024xf32>
    %c0_1 = arith.constant 0 : index
    %c0_2 = arith.constant 0 : index
    %3 = vector.load %arg2[%c0_1, %c0_2] : memref<2x1024xf32, #tpu.memory_space<vmem>>, vector<2x1024xf32>
    tpu.vector_store %arg2[%c0_1, %c0_2], %2 {strides = array<i32>} : memref<2x1024xf32, #tpu.memory_space<vmem>>, vector<2x1024xf32>,
    return
  }
  func.func @transform_0(%arg0: i32) -> (i32, i32) {
    %c0_i32 = arith.constant 0 : i32
    %c0_i32_0 = arith.constant 0 : i32
    return %arg0, %c0_i32 : i32, i32
  }
  func.func @transform_1(%arg0: i32) -> (i32, i32) {
    %c0_i32 = arith.constant 0 : i32
    %c0_i32_0 = arith.constant 0 : i32
    return %arg0, %c0_i32 : i32, i32
  }
}

</mosaic_0001>

<bundles_post_ra>
// kernel: tpu_custom_call.1
= control target key start
LH: loop header
LB: loop body
LE: loop exit
PB: predicated region body
PF: predicated region fallthrough
CT: control target
= control target key end

     0   :  { %6 = vsyncpa [#allocation3], 0  ;;  %s128_s0 = inlined_call_operand.hbm [shape: f32[2,1024], index: 0, kind: input, shape index: {}, may-alias: {0,1}]   ;;  %s129_s1 = inlined_call_operand.hbm [shape: f32[2,1024], index: 1, kind: output, shape index: {}, may-alias: {0,1}]  }
   0x1   :  { %7 = vsyncpa [#allocation4], 0  ;;  %s92_s6 = smov [#allocation2]   ;;  %s44_s10 = scalar_lea.hbm %s128_s0, 256 }
   0x2   :  { %s14_s7 = sshll.u32 %s92_s6, 4  ;;  %p45_p0 = scmp.ne.s32.totalorder %s128_s0, %s44_s10  ;;  %s15_s7 = int_to_ptr.vmem [resolvable:$true] %s14_s7 }
   0x3   :  { %p48_p1 = scmp.lt.u32.totalorder %s44_s10, %s128_s0 }
   0x5   :  { %p50_p2 = pnand %p48_p1, %p45_p0 }
   0x7   :  { %53 = shalt.err (!%p50_p2)
}
   0x8   :  { %s54_s15 = scalar_lea.vmem %s15_s7, 256  ;;  %p59_p4 = scmp.lt.s32.totalorder %s15_s7, %s15_s7 }
   0x9   :  { %p55_p3 = scmp.ne.s32.totalorder %s15_s7, %s54_s15  ;;  %p60_p5 = scmp.lt.s32.totalorder %s54_s15, %s54_s15 }
   0xb   :  { %p61_p6 = por %p60_p5, %p59_p4 }
   0xd   :  { %p62_p7 = pnand %p61_p6, %p55_p3 }
   0xf   :  { %65 = shalt.err (!%p62_p7)
}
  0x10   :  { %17 = dma.hbm_to_vmem [thread:$0]  %s128_s0, 256, %s15_s7, [#allocation3]  }
  0x11   :  { %88 = dma.done.wait [#allocation3], 256  }
  0x12   :  { %89 = vsyncadd [#allocation3], 4294967040  ;;  %s93_s18 = smov [#allocation5]   ;;  %v21_v0 = vld [vmem:[#allocation2] sm:$0xff]  ;;  %v22_v1 = vld [vmem:[#allocation2 + $0x8] sm:$0xff] }
  0x13   :  { %s33_s19 = sshll.u32 %s93_s18, 4  ;;  %v23_v2 = vmax.f32 %v21_v0, 0.0  ;;  %v24_v3 = vmax.f32 %v22_v1, 0.0  ;;  %s34_s19 = int_to_ptr.vmem [resolvable:$true] %s33_s19 }
  0x14   :  { %s66_s20 = scalar_lea.vmem %s34_s19, 256  ;;  %p71_p9 = scmp.lt.s32.totalorder %s34_s19, %s34_s19 }
  0x15   :  { %25 = vst [vmem:[#allocation5] sm:$0xff] %v23_v2  ;;  %26 = vst [vmem:[#allocation5 + $0x8] sm:$0xff] %v24_v3  ;;  %p67_p8 = scmp.ne.s32.totalorder %s34_s19, %s66_s20  ;;  %p72_p10 = scmp.lt.s32.totalorder %s66_s20, %s66_s20 }
  0x17   :  { %p73_p11 = por %p72_p10, %p71_p9 }
  0x19   :  { %p74_p12 = pnand %p73_p11, %p67_p8 }
  0x1b   :  { %77 = shalt.err (!%p74_p12)
}
  0x1c   :  { %s78_s22 = scalar_lea.hbm %s129_s1, 256 }
  0x1d   :  { %p79_p13 = scmp.ne.s32.totalorder %s129_s1, %s78_s22  ;;  %p82_p0 = scmp.lt.u32.totalorder %s78_s22, %s129_s1 }
  0x1f   :  { %p84_p1 = pnand %p82_p0, %p79_p13 }
  0x21   :  { %87 = shalt.err (!%p84_p1)
}
  0x22   :  { %36 = dma.vmem_to_hbm [thread:$0]  %s34_s19, 256, %s129_s1, [#allocation4]  }
  0x23   :  { %90 = dma.done.wait [#allocation4], 256  }
  0x24   :  { %91 = vsyncadd [#allocation4], 4294967040 }
  0x25   :  { %40 = vsyncpa [#allocation3], 1 }
  0x26   :  { %41 = vsyncpa [#allocation4], 1 }

</bundles_post_ra>
